<compile_context>
chip_gen: v6e
topology: v6e:2x2x1
jax: 0.10.0
libtpu: 0.0.40
codegen_flags: <defaults>
</compile_context>

<pallas_src>
import functools

import jax
import jax.numpy as jnp
from jax.experimental import pallas as pl
from jax.experimental.pallas import tpu as pltpu


def _round_up(v, m):
    return (v + m - 1) // m * m


def _largest_div_tile(dim_p, cap):
    """Largest 128-multiple divisor of dim_p (a multiple of 128) that is <= cap."""
    cap = max(128, min(dim_p, cap))
    for t in range(cap // 128 * 128, 127, -128):
        if dim_p % t == 0:
            return t
    return 128


def _vmem_budget_bytes():
    cap = 64 * 1024 * 1024  # conservative fallback (v7x has 64 MiB/TC)
    try:
        info = pltpu.get_tpu_info()
        cap = int(getattr(info, "vmem_capacity_bytes", cap))
    except Exception:
        pass
    return int(cap * 0.6)  # leave headroom for double buffers + compiler scratch


def prepare_fcbn_params(weight, gamma, beta, *, compute_dtype=None):
    """One-time (init-time) parameter prep.

    weight: (out_features, in_features)  -- PyTorch Linear layout
    Returns weight transposed to (in_features, out_features_padded) in the
    compute dtype (so the kernel contraction is (((1,),(0,)),...) with no
    in-kernel transpose), plus lane-padded f32 gamma/beta as (1, cout_p).
    """
    cout, cin = weight.shape
    compute_dtype = compute_dtype or weight.dtype
    cout_p = _round_up(cout, 128)
    w_t = jnp.pad(weight.T.astype(compute_dtype), ((0, 0), (0, cout_p - cout)))
    gamma_p = jnp.pad(gamma.astype(jnp.float32), (0, cout_p - cout),
                      constant_values=1.0).reshape(1, cout_p)
    beta_p = jnp.pad(beta.astype(jnp.float32), (0, cout_p - cout)).reshape(1, cout_p)
    return w_t, gamma_p, beta_p


def _fcbn_kernel(x_ref, w_ref, gamma_ref, beta_ref, o_ref, *scratch, eps, inv_n):
    # x_ref:     (N, TILE_K)         compute dtype
    # w_ref:     (TILE_K, TILE_CO)   compute dtype (pre-transposed at init)
    # gamma_ref: (1, TILE_CO)        f32
    # beta_ref:  (1, TILE_CO)        f32
    # o_ref:     (N, TILE_CO)        output dtype
    # scratch:   optional f32 (N, TILE_CO) accumulator; when the output is f32
    #            we accumulate directly into o_ref (it is k-invariant and
    #            VMEM-resident across the K axis anyway).
    acc_ref = scratch[0] if scratch else o_ref
    k = pl.program_id(1)

    @pl.when(k == 0)
    def _init():
        acc_ref[...] = jnp.zeros_like(acc_ref)

    # Linear (no bias). f32 accumulation via preferred_element_type; no
    # explicit operand upcasts (bf16 operands take the native MXU path).
    acc_ref[...] += jax.lax.dot_general(
        x_ref[...],
        w_ref[...],
        dimension_numbers=(((1,), (0,)), ((), ())),
        preferred_element_type=jnp.float32,
    )

    @pl.when(k == pl.num_programs(1) - 1)
    def _finalize():
        y = acc_ref[...]                                         # (N, TILE_CO) f32
        # BatchNorm1d training-mode batch stats (biased variance), centered
        # two-pass form over the resident accumulator (no cancellation).
        mean = jnp.sum(y, axis=0, keepdims=True) * inv_n         # (1, TILE_CO)
        centered = y - mean
        var = jnp.sum(centered * centered, axis=0, keepdims=True) * inv_n
        inv_std = jax.lax.rsqrt(var + eps)                       # EUP
        scale = gamma_ref[...] * inv_std
        out = jnp.maximum(centered * scale + beta_ref[...], 0.0) # ReLU
        o_ref[...] = out.astype(o_ref.dtype)


def fc_bn(x, w_prep, gamma_p, beta_p, out_features, *, eps=1e-5):
    """Forward of FcBn.

    x:       (N, in_features)
    w_prep:  (in_features, cout_p)  -- from prepare_fcbn_params (compute dtype)
    gamma_p: (1, cout_p) f32
    beta_p:  (1, cout_p) f32
    returns  (N, out_features) in x.dtype
    """
    n, cin = x.shape
    cin_w, cout_p = w_prep.shape
    assert cin_w == cin and cout_p % 128 == 0 and out_features <= cout_p

    compute_dtype = w_prep.dtype
    out_dtype = x.dtype
    if x.dtype != compute_dtype:
        x = x.astype(compute_dtype)

    itemsize = jnp.dtype(compute_dtype).itemsize
    out_itemsize = jnp.dtype(out_dtype).itemsize
    use_scratch = out_dtype != jnp.float32

    budget = _vmem_budget_bytes()

    # ---- K (C_in) tiling: collapse to one resident x block whenever it fits.
    if 2 * n * cin * itemsize <= budget // 3:
        tile_k, k_steps = cin, 1          # full-dim block: x passes through un-padded
    else:
        # TODO(synk): hoist this cin pad to init / mask the ragged tail tile.
        cin_p = _round_up(cin, 128)
        if cin_p != cin:
            x = jnp.pad(x, ((0, 0), (0, cin_p - cin)))
            w_prep = jnp.pad(w_prep, ((0, cin_p - cin), (0, 0)))
        cap_k = max(128, (budget // 3) // (2 * n * itemsize) // 128 * 128)
        tile_k = _largest_div_tile(cin_p, cap_k)
        k_steps = cin_p // tile_k

    # ---- C_out tiling: largest divisor tile that fits the remaining budget.
    per_co = (2 * tile_k * itemsize                    # weight block (dbl-buffered)
              + 2 * n * out_itemsize                   # output block
              + (n * 4 if use_scratch else 0))         # f32 accumulator
    co_budget = max(0, budget - 2 * n * tile_k * itemsize)
    cap_co = max(128, (co_budget * 2 // 3) // max(per_co, 1) // 128 * 128)
    tile_co = _largest_div_tile(cout_p, cap_co)
    co_steps = cout_p // tile_co

    grid = (co_steps, k_steps)
    multi_step = co_steps * k_steps > 2

    # Weight spec: deeper pipelining only helps when the grid is multi-step
    # (hides the weight DMA, which is the binding resource at small N on v5e).
    if multi_step:
        w_spec = pl.BlockSpec((tile_k, tile_co), lambda i, k: (k, i),
                              pipeline_mode=pl.Buffered(3))
        w_bufs = 3
    else:
        w_spec = pl.BlockSpec((tile_k, tile_co), lambda i, k: (k, i))
        w_bufs = 2

    vmem_est = (2 * n * tile_k * itemsize
                + w_bufs * tile_k * tile_co * itemsize
                + 2 * n * tile_co * out_itemsize
                + 4 * tile_co * 4
                + (n * tile_co * 4 if use_scratch else 0))
    vmem_limit = int(min(max(2 * vmem_est, 16 * 1024 * 1024), budget))

    # x is re-streamed per C_out tile only when the K axis is actually tiled.
    x_read_factor = 1 if k_steps == 1 else co_steps
    cin_used = tile_k * k_steps
    cost = pl.CostEstimate(
        flops=2 * n * cin_used * cout_p,
        transcendentals=cout_p,
        bytes_accessed=int(n * cin_used * itemsize * x_read_factor
                           + cin_used * cout_p * itemsize
                           + 2 * cout_p * 4
                           + n * cout_p * out_itemsize),
    )

    kernel = functools.partial(_fcbn_kernel, eps=float(eps), inv_n=1.0 / float(n))

    out = pl.pallas_call(
        kernel,
        out_shape=jax.ShapeDtypeStruct((n, cout_p), out_dtype),
        grid_spec=pltpu.PrefetchScalarGridSpec(
            num_scalar_prefetch=0,
            grid=grid,
            in_specs=[
                pl.BlockSpec((n, tile_k), lambda i, k: (0, k)),    # x (resident if k_steps==1)
                w_spec,                                            # weight (cin, cout_p)
                pl.BlockSpec((1, tile_co), lambda i, k: (0, i)),   # gamma (k-invariant)
                pl.BlockSpec((1, tile_co), lambda i, k: (0, i)),   # beta  (k-invariant)
            ],
            out_specs=pl.BlockSpec((n, tile_co), lambda i, k: (0, i)),
            scratch_shapes=([pltpu.VMEM((n, tile_co), jnp.float32)]
                            if use_scratch else []),
        ),
        compiler_params=pltpu.CompilerParams(
            dimension_semantics=("parallel", "arbitrary"),
            vmem_limit_bytes=vmem_limit,
        ),
        cost_estimate=cost,
    )(x, w_prep, gamma_p, beta_p)

    return out[:, :out_features]


if __name__ == "__main__":
    key = jax.random.PRNGKey(0)
    kx, kw, kg, kb = jax.random.split(key, 4)

    # Small but non-trivial: un-aligned C_in exercises the full-dim single-K
    # path (x passed through without padding); C_out pads once at init.
    batch = 32
    in_features = 300
    out_features = 333

    x = jax.random.normal(kx, (batch, in_features), dtype=jnp.float32)
    weight = jax.random.normal(kw, (out_features, in_features), dtype=jnp.float32) * 0.1
    gamma = 1.0 + 0.1 * jax.random.normal(kg, (out_features,), dtype=jnp.float32)
    beta = 0.1 * jax.random.normal(kb, (out_features,), dtype=jnp.float32)

    # Pure-JAX reference (same math as PyTorch training-mode forward).
    y = jnp.dot(x, weight.T, precision=jax.lax.Precision.HIGHEST)
    mean = y.mean(axis=0, keepdims=True)
    var = ((y - mean) ** 2).mean(axis=0, keepdims=True)
    ref = jnp.maximum((y - mean) * jax.lax.rsqrt(var + 1e-5) * gamma + beta, 0.0)

    # f32 compute path (tight check; no scratch — accumulates into the output).
    params_f32 = prepare_fcbn_params(weight, gamma, beta)
    out_f32 = jax.block_until_ready(fc_bn(x, *params_f32, out_features))
    assert out_f32.shape == ref.shape, f"shape mismatch {out_f32.shape} vs {ref.shape}"
    assert jnp.allclose(out_f32, ref, atol=1e-2, rtol=1e-2), "f32 mismatch vs reference"

    # bf16 compute path (perf config: halves HBM weight bytes, native MXU path;
    # BN math stays f32 inside the kernel), looser tolerance.
    params_bf16 = prepare_fcbn_params(weight, gamma, beta, compute_dtype=jnp.bfloat16)
    out_bf16 = jax.block_until_ready(fc_bn(x, *params_bf16, out_features))
    assert out_bf16.shape == ref.shape, f"shape mismatch {out_bf16.shape} vs {ref.shape}"
    assert jnp.allclose(out_bf16, ref, atol=6e-2, rtol=6e-2), "bf16 mismatch vs reference"

    print("KERNEL_OK")
</pallas_src>

<mosaic_0001>
module attributes {stable_mosaic.version = 11 : i64} {
  func.func @_fcbn_kernel(%arg0: i32, %arg1: i32, %arg2: memref<32x300xf32, #tpu.memory_space<vmem>>, %arg3: memref<300x384xf32, #tpu.memory_space<vmem>>, %arg4: memref<1x384xf32, #tpu.memory_space<vmem>>, %arg5: memref<1x384xf32, #tpu.memory_space<vmem>>, %arg6: memref<32x384xf32, #tpu.memory_space<vmem>>) attributes {dimension_semantics = [#tpu.dimension_semantics<parallel>, #tpu.dimension_semantics<arbitrary>], iteration_bounds = array<i64: 1, 1>, scalar_prefetch = 0 : i64, scratch_operands = 0 : i64, tpu.core_type = #tpu.core_type<tc>, window_params = [{transform_indices = @transform_0, window_bounds = array<i64: 32, 300>}, {transform_indices = @transform_1, window_bounds = array<i64: 300, 384>}, {transform_indices = @transform_2, window_bounds = array<i64: 1, 384>}, {transform_indices = @transform_3, window_bounds = array<i64: 1, 384>}, {transform_indices = @transform_4, window_bounds = array<i64: 32, 384>}]} {
    %c0_i32 = arith.constant 0 : i32
    %0 = arith.cmpi eq, %arg1, %c0_i32 : i32
    %1 = arith.extui %0 : i1 to i32
    %c0_i32_0 = arith.constant 0 : i32
    %2 = arith.cmpi ne, %1, %c0_i32_0 : i32
    scf.if %2 {
      %cst_10 = arith.constant 0.000000e+00 : f32
      %12 = vector.broadcast %cst_10 : f32 to vector<32x384xf32>
      %c0_11 = arith.constant 0 : index
      %c0_12 = arith.constant 0 : index
      %13 = vector.load %arg6[%c0_11, %c0_12] : memref<32x384xf32, #tpu.memory_space<vmem>>, vector<32x384xf32>
      tpu.vector_store %arg6[%c0_11, %c0_12], %12 {strides = array<i32>} : memref<32x384xf32, #tpu.memory_space<vmem>>, vector<32x384xf32>,
    } else {
    }
    %c0 = arith.constant 0 : index
    %c0_1 = arith.constant 0 : index
    %3 = vector.load %arg6[%c0, %c0_1] : memref<32x384xf32, #tpu.memory_space<vmem>>, vector<32x384xf32>
    %c0_2 = arith.constant 0 : index
    %c0_3 = arith.constant 0 : index
    %4 = vector.load %arg2[%c0_2, %c0_3] : memref<32x300xf32, #tpu.memory_space<vmem>>, vector<32x300xf32>
    %c0_4 = arith.constant 0 : index
    %c0_5 = arith.constant 0 : index
    %5 = vector.load %arg3[%c0_4, %c0_5] : memref<300x384xf32, #tpu.memory_space<vmem>>, vector<300x384xf32>
    %cst = arith.constant dense<0.000000e+00> : vector<32x384xf32>
    %6 = tpu.matmul %4, %5, %cst {dimension_numbers = #tpu.dot_dimension_numbers<[1], [0], [0], [1], [0, 0, 1, 1], [], []>} : vector<32x300xf32>, vector<300x384xf32>, vector<32x384xf32> -> vector<32x384xf32>
    %7 = arith.addf %3, %6 : vector<32x384xf32>
    %c0_6 = arith.constant 0 : index
    %c0_7 = arith.constant 0 : index
    %8 = vector.load %arg6[%c0_6, %c0_7] : memref<32x384xf32, #tpu.memory_space<vmem>>, vector<32x384xf32>
    tpu.vector_store %arg6[%c0_6, %c0_7], %7 {strides = array<i32>} : memref<32x384xf32, #tpu.memory_space<vmem>>, vector<32x384xf32>,
    %c0_i32_8 = arith.constant 0 : i32
    %9 = arith.cmpi eq, %arg1, %c0_i32_8 : i32
    %10 = arith.extui %9 : i1 to i32
    %c0_i32_9 = arith.constant 0 : i32
    %11 = arith.cmpi ne, %10, %c0_i32_9 : i32
    scf.if %11 {
      %c0_10 = arith.constant 0 : index
      %c0_11 = arith.constant 0 : index
      %12 = vector.load %arg6[%c0_10, %c0_11] : memref<32x384xf32, #tpu.memory_space<vmem>>, vector<32x384xf32>
      %cst_12 = arith.constant dense<0.000000e+00> : vector<384xf32>
      %13 = vector.multi_reduction <add>, %12, %cst_12 [0] : vector<32x384xf32> to vector<384xf32>
      %14 = vector.shape_cast %13 : vector<384xf32> to vector<1x384xf32>
      %cst_13 = arith.constant 3.125000e-02 : f32
      %15 = vector.broadcast %cst_13 : f32 to vector<1x384xf32>
      %16 = arith.mulf %14, %15 : vector<1x384xf32>
      %17 = vector.broadcast %16 : vector<1x384xf32> to vector<32x384xf32>
      %18 = arith.subf %12, %17 : vector<32x384xf32>
      %19 = arith.mulf %18, %18 : vector<32x384xf32>
      %cst_14 = arith.constant dense<0.000000e+00> : vector<384xf32>
      %20 = vector.multi_reduction <add>, %19, %cst_14 [0] : vector<32x384xf32> to vector<384xf32>
      %21 = vector.shape_cast %20 : vector<384xf32> to vector<1x384xf32>
      %cst_15 = arith.constant 3.125000e-02 : f32
      %22 = vector.broadcast %cst_15 : f32 to vector<1x384xf32>
      %23 = arith.mulf %21, %22 : vector<1x384xf32>
      %cst_16 = arith.constant 9.99999974E-6 : f32
      %24 = vector.broadcast %cst_16 : f32 to vector<1x384xf32>
      %25 = arith.addf %23, %24 : vector<1x384xf32>
      %26 = math.rsqrt %25 : vector<1x384xf32>
      %c0_17 = arith.constant 0 : index
      %c0_18 = arith.constant 0 : index
      %27 = vector.load %arg4[%c0_17, %c0_18] : memref<1x384xf32, #tpu.memory_space<vmem>>, vector<1x384xf32>
      %28 = arith.mulf %27, %26 : vector<1x384xf32>
      %29 = vector.broadcast %28 : vector<1x384xf32> to vector<32x384xf32>
      %30 = arith.mulf %18, %29 : vector<32x384xf32>
      %c0_19 = arith.constant 0 : index
      %c0_20 = arith.constant 0 : index
      %31 = vector.load %arg5[%c0_19, %c0_20] : memref<1x384xf32, #tpu.memory_space<vmem>>, vector<1x384xf32>
      %32 = vector.broadcast %31 : vector<1x384xf32> to vector<32x384xf32>
      %33 = arith.addf %30, %32 : vector<32x384xf32>
      %cst_21 = arith.constant 0.000000e+00 : f32
      %34 = vector.broadcast %cst_21 : f32 to vector<32x384xf32>
      %35 = arith.maximumf %33, %34 : vector<32x384xf32>
      %c0_22 = arith.constant 0 : index
      %c0_23 = arith.constant 0 : index
      %36 = vector.load %arg6[%c0_22, %c0_23] : memref<32x384xf32, #tpu.memory_space<vmem>>, vector<32x384xf32>
      tpu.vector_store %arg6[%c0_22, %c0_23], %35 {strides = array<i32>} : memref<32x384xf32, #tpu.memory_space<vmem>>, vector<32x384xf32>,
    } else {
    }
    return
  }
  func.func @transform_0(%arg0: i32, %arg1: i32) -> (i32, i32) {
    %c0_i32 = arith.constant 0 : i32
    %c0_i32_0 = arith.constant 0 : i32
    return %c0_i32, %arg1 : i32, i32
  }
  func.func @transform_1(%arg0: i32, %arg1: i32) -> (i32, i32) {
    %c0_i32 = arith.constant 0 : i32
    return %arg1, %arg0 : i32, i32
  }
  func.func @transform_2(%arg0: i32, %arg1: i32) -> (i32, i32) {
    %c0_i32 = arith.constant 0 : i32
    %c0_i32_0 = arith.constant 0 : i32
    return %c0_i32, %arg0 : i32, i32
  }
  func.func @transform_3(%arg0: i32, %arg1: i32) -> (i32, i32) {
    %c0_i32 = arith.constant 0 : i32
    %c0_i32_0 = arith.constant 0 : i32
    return %c0_i32, %arg0 : i32, i32
  }
  func.func @transform_4(%arg0: i32, %arg1: i32) -> (i32, i32) {
    %c0_i32 = arith.constant 0 : i32
    %c0_i32_0 = arith.constant 0 : i32
    return %c0_i32, %arg0 : i32, i32
  }
}

</mosaic_0001>

<bundles_post_ra>
// kernel: tpu_custom_call.1
= control target key start
LH: loop header
LB: loop body
LE: loop exit
PB: predicated region body
PF: predicated region fallthrough
CT: control target
= control target key end

     0   :  { %9 = vsyncpa [#allocation3], 0  ;;  %s1187_s0 = inlined_call_operand.hbm [shape: f32[32,300], index: 0, kind: input, shape index: {}]   ;;  %s1188_s1 = inlined_call_operand.hbm [shape: f32[300,384], index: 1, kind: input, shape index: {}]   ;;  %s1189_s2 = inlined_call_operand.vmem [shape: f32[1,384], index: 2, kind: input, shape index: {}]   ;;  %s1190_s3 = inlined_call_operand.hbm [shape: f32[1,384], index: 3, kind: input, shape index: {}]   ;;  %s1191_s4 = inlined_call_operand.hbm [shape: f32[32,384], index: 4, kind: output, shape index: {}]  }
   0x1   :  { %10 = vsyncpa [#allocation6], 0 }
   0x2   :  { %11 = vsyncpa [#allocation4], 0  ;;  %s1022_s15 = smov [#allocation5]   ;;  %s1023_s17 = smov [#allocation2]  }
   0x3   :  { %s29_s16 = sshll.u32 %s1022_s15, 4  ;;  %s17_s18 = sshll.u32 %s1023_s17, 4  ;;  %s30_s16 = int_to_ptr.vmem [resolvable:$true] %s29_s16  ;;  %s18_s18 = int_to_ptr.vmem [resolvable:$true] %s17_s18 }
   0x4   :  { %s944_s19 = scalar_lea.vmem %s30_s16, 14592  ;;  %p949_p1 = scmp.lt.s32.totalorder %s30_s16, %s30_s16 }
   0x5   :  { %p945_p0 = scmp.ne.s32.totalorder %s30_s16, %s944_s19  ;;  %p950_p2 = scmp.lt.s32.totalorder %s944_s19, %s944_s19 }
   0x7   :  { %p951_p3 = por %p950_p2, %p949_p1 }
   0x9   :  { %p952_p4 = pnand %p951_p3, %p945_p0 }
   0xb   :  { %955 = shalt.err (!%p952_p4)
}
   0xc   :  { %s1024_s20 = smov 384   ;;  %s1025_s21 = smov 24  }
   0xd   :  { %35 = dma.hbm_to_vmem [thread:$0]  %s1188_s1, 14592, %s30_s16, [#allocation6], %s1024_s20, %s1024_s20, %s1025_s21  }
   0xe   :  { %s964_s24 = scalar_lea.vmem %s18_s18, 1536  ;;  %p969_p6 = scmp.lt.s32.totalorder %s18_s18, %s18_s18 }
   0xf   :  { %p965_p5 = scmp.ne.s32.totalorder %s18_s18, %s964_s24  ;;  %p970_p7 = scmp.lt.s32.totalorder %s964_s24, %s964_s24 }
  0x11   :  { %p971_p8 = por %p970_p7, %p969_p6 }
  0x13   :  { %p972_p9 = pnand %p971_p8, %p965_p5 }
  0x15   :  { %975 = shalt.err (!%p972_p9)
}
  0x16   :  { %23 = dma.hbm_to_vmem [thread:$0]  %s1187_s0, 1536, %s18_s18, [#allocation3], %s1024_s20, %s1024_s20, %s1025_s21  }
  0x17   :  { %s1026_s27 = smov [#allocation7]  }
  0x18   :  { %s44_s28 = sshll.u32 %s1026_s27, 4  ;;  %s45_s28 = int_to_ptr.vmem [resolvable:$true] %s44_s28 }
  0x19   :  { %s984_s29 = scalar_lea.vmem %s45_s28, 48  ;;  %s988_s1 = scalar_lea.vmem %s45_s28, 64 }
  0x1a   :  { %p985_p10 = scmp.ne.s32.totalorder %s45_s28, %s984_s29  ;;  %p989_p11 = scmp.lt.s32.totalorder %s45_s28, %s45_s28 }
  0x1b   :  { %p990_p12 = scmp.lt.s32.totalorder %s988_s1, %s984_s29 }
  0x1d   :  { %p991_p13 = por %p990_p12, %p989_p11 }
  0x1f   :  { %p992_p0 = pnand %p991_p13, %p985_p10 }
  0x21   :  { %995 = shalt.err (!%p992_p0)
}
  0x22   :  { %47 = dma.hbm_to_vmem [thread:$0]  %s1190_s3, 48, %s45_s28, [#allocation6]  }
  0x23   :  { %1016 = dma.done.wait [#allocation3], 1536  }
  0x24   :  { %1017 = vsyncadd [#allocation3], 4294965760 }
  0x25   :  { %1018 = dma.done.wait [#allocation6], 14640  }
  0x26   :  { %1019 = vsyncadd [#allocation6], 4294952656  ;;  %v1027_v0 = vmov 0.0   ;;  %vm224_vm0 = vcmask 1043456   ;;  %v143_v1 = vld [vmem:[#allocation5 + $0x170] sm:$0xff]  ;;  %v142_v3 = vld [vmem:[#allocation5 + $0x168] sm:$0xff] }
  0x27   :  { %387 = vmatprep.mubr.f32.mxu1 %v1027_v0  ;;  %v209_v2 = vld [vmem:[#allocation5 + $0x380] sm:$0xf]  ;;  %234 = vmatprep.subr.mxu0 %v143_v1  ;;  %v208_v4 = vld [vmem:[#allocation5 + $0x378] sm:$0xf]  ;;  %v206_v6 = vld [vmem:[#allocation5 + $0x368] sm:$0xff]  ;;  %vm211_vm1 = vcmask 359424  }
  0x28   :  { %839 = vmatprep.subr.msk.mxu1 %vm224_vm0, %v209_v2  ;;  %v140_v5 = vld [vmem:[#allocation5 + $0x158] sm:$0xff]  ;;  %235 = vmatpush1.msra.mxu0 %v142_v3  ;;  %v139_v7 = vld [vmem:[#allocation5 + $0x150] sm:$0xff]  ;;  %v205_v8 = vld [vmem:[#allocation5 + $0x360] sm:$0xff] }
  0x29   :  { %840 = vmatpush1.msk.msra.mxu1 %vm224_vm0, %v208_v4  ;;  %v137_v9 = vld [vmem:[#allocation5 + $0x140] sm:$0xff]  ;;  %236 = vmatprep.subr.mxu0 %v140_v5  ;;  %v203_v10 = vld [vmem:[#allocation5 + $0x350] sm:$0xff]  ;;  %v136_v11 = vld [vmem:[#allocation5 + $0x138] sm:$0xff] }
  0x2a   :  { %345 = vmatprep.subr.mxu1 %v206_v6  ;;  %v202_v12 = vld [vmem:[#allocation5 + $0x348] sm:$0xff]  ;;  %237 = vmatpush1.msra.mxu0 %v139_v7  ;;  %v200_v14 = vld [vmem:[#allocation5 + $0x338] sm:$0xff]  ;;  %v133_v15 = vld [vmem:[#allocation5 + $0x120] sm:$0xff] }
  0x2b   :  { %346 = vmatpush1.msra.mxu1 %v205_v8  ;;  %v134_v13 = vld [vmem:[#allocation5 + $0x128] sm:$0xff]  ;;  %238 = vmatprep.subr.mxu0 %v137_v9  ;;  %v199_v16 = vld [vmem:[#allocation5 + $0x330] sm:$0xff]  ;;  %v197_v18 = vld [vmem:[#allocation5 + $0x320] sm:$0xff] }
  0x2c   :  { %347 = vmatprep.subr.mxu1 %v203_v10  ;;  %239 = vmatpush1.msra.mxu0 %v136_v11  ;;  %v131_v17 = vld [vmem:[#allocation5 + $0x110] sm:$0xff]  ;;  %v130_v19 = vld [vmem:[#allocation5 + $0x108] sm:$0xff]  ;;  %v196_v20 = vld [vmem:[#allocation5 + $0x318] sm:$0xff] }
  0x2d   :  { %348 = vmatpush1.msra.mxu1 %v202_v12  ;;  %240 = vmatprep.subr.mxu0 %v134_v13  ;;  %v128_v21 = vld [vmem:[#allocation5 + $0xf8] sm:$0xff]  ;;  %v194_v22 = vld [vmem:[#allocation5 + $0x308] sm:$0xff]  ;;  %v127_v23 = vld [vmem:[#allocation5 + $0xf0] sm:$0xff] }
  0x2e   :  { %349 = vmatprep.subr.mxu1 %v200_v14  ;;  %241 = vmatpush1.msra.mxu0 %v133_v15  ;;  %v193_v24 = vld [vmem:[#allocation5 + $0x300] sm:$0xff]  ;;  %v192_v26 = vld [vmem:[#allocation5 + $0x2f8] sm:$0xff]  ;;  %v1073_v28 = vld [vmem:[#allocation2 + $0x10] sm:$0xff] }
  0x2f   :  { %350 = vmatpush1.msra.mxu1 %v199_v16  ;;  %242 = vmatprep.subr.mxu0 %v131_v17  ;;  %v125_v25 = vld [vmem:[#allocation5 + $0xe0] sm:$0xff]  ;;  %v124_v27 = vld [vmem:[#allocation5 + $0xd8] sm:$0xff]  ;;  %v122_v30 = vld [vmem:[#allocation5 + $0xc8] sm:$0xff] }
  0x30   :  { %351 = vmatprep.subr.mxu1 %v197_v18  ;;  %243 = vmatpush1.msra.mxu0 %v130_v19  ;;  %v144_v29 = vld [vmem:[#allocation5 + $0x178] sm:$0xff]  ;;  %v189_v31 = vld [vmem:[#allocation5 + $0x2e0] sm:$0xff]  ;;  %v119_v34 = vld [vmem:[#allocation5 + $0xb0] sm:$0xff] }
  0x31   :  { %352 = vmatpush1.msra.mxu1 %v196_v20  ;;  %244 = vmatprep.subr.mxu0 %v128_v21  ;;  %v121_v32 = vld [vmem:[#allocation5 + $0xc0] sm:$0xff]  ;;  %v186_v35 = vld [vmem:[#allocation5 + $0x2c8] sm:$0xff]  ;;  %v116_v38 = vld [vmem:[#allocation5 + $0x98] sm:$0xff] }
  0x32   :  { %353 = vmatprep.subr.mxu1 %v194_v22  ;;  %245 = vmatpush1.msra.mxu0 %v127_v23  ;;  %v141_v33 = vld [vmem:[#allocation5 + $0x160] sm:$0xff]  ;;  %v118_v36 = vld [vmem:[#allocation5 + $0xa8] sm:$0xff]  ;;  %v183_v39 = vld [vmem:[#allocation5 + $0x2b0] sm:$0xff] }
  0x33   :  { %354 = vmatpush1.msra.mxu1 %v193_v24  ;;  %246 = vmatprep.subr.mxu0 %v125_v25  ;;  %v138_v37 = vld [vmem:[#allocation5 + $0x148] sm:$0xff]  ;;  %v115_v40 = vld [vmem:[#allocation5 + $0x90] sm:$0xff]  ;;  %v113_v42 = vld [vmem:[#allocation5 + $0x80] sm:$0xff] }
  0x34   :  { %850 = vmatprep.subr.mxu1 %v192_v26  ;;  %247 = vmatpush1.msra.mxu0 %v124_v27  ;;  %v135_v41 = vld [vmem:[#allocation5 + $0x130] sm:$0xff]  ;;  %v180_v43 = vld [vmem:[#allocation5 + $0x298] sm:$0xff]  ;;  %v110_v46 = vld [vmem:[#allocation5 + $0x68] sm:$0xff] }
  0x35   :  { %841 = vmatmul.mubr.msk.f32.vlgmr.msra.gmra.mxu1 %vm211_vm1, %v1073_v28  ;;  %248 = vmatprep.subr.mxu0 %v122_v30  ;;  %v112_v44 = vld [vmem:[#allocation5 + $0x78] sm:$0xff]  ;;  %v177_v47 = vld [vmem:[#allocation5 + $0x280] sm:$0xff]  ;;  %v107_v50 = vld [vmem:[#allocation5 + $0x50] sm:$0xff] }
  0x36   :  { %851 = vmatpush3.msra.mxu1 %v144_v29  ;;  %249 = vmatpush1.msra.mxu0 %v121_v32  ;;  %v132_v45 = vld [vmem:[#allocation5 + $0x118] sm:$0xff]  ;;  %v109_v48 = vld [vmem:[#allocation5 + $0x60] sm:$0xff]  ;;  %v174_v51 = vld [vmem:[#allocation5 + $0x268] sm:$0xff] }
  0x37   :  { %852 = vmatprep.subr.mxu1 %v189_v31  ;;  %250 = vmatprep.subr.mxu0 %v119_v34  ;;  %v129_v49 = vld [vmem:[#allocation5 + $0x100] sm:$0xff]  ;;  %v106_v52 = vld [vmem:[#allocation5 + $0x48] sm:$0xff]  ;;  %v104_v54 = vld [vmem:[#allocation5 + $0x38] sm:$0xff] }
  0x38   :  { %853 = vmatpush3.msra.mxu1 %v141_v33  ;;  %251 = vmatpush1.msra.mxu0 %v118_v36  ;;  %v126_v53 = vld [vmem:[#allocation5 + $0xe8] sm:$0xff]  ;;  %v171_v55 = vld [vmem:[#allocation5 + $0x250] sm:$0xff]  ;;  %v101_v58 = vld [vmem:[#allocation5 + $0x20] sm:$0xff] }
  0x39   :  { %854 = vmatprep.subr.mxu1 %v186_v35  ;;  %252 = vmatprep.subr.mxu0 %v116_v38  ;;  %v103_v56 = vld [vmem:[#allocation5 + $0x30] sm:$0xff]  ;;  %v168_v59 = vld [vmem:[#allocation5 + $0x238] sm:$0xff]  ;;  %v98_v62 = vld [vmem:[#allocation5 + $0x8] sm:$0xff] }
  0x3a   :  { %855 = vmatpush3.msra.mxu1 %v138_v37  ;;  %253 = vmatpush1.msra.mxu0 %v115_v40  ;;  %v123_v57 = vld [vmem:[#allocation5 + $0xd0] sm:$0xff]  ;;  %v100_v60 = vld [vmem:[#allocation5 + $0x18] sm:$0xff]  ;;  %v165_v63 = vld [vmem:[#allocation5 + $0x220] sm:$0xff] }
  0x3b   :  { %856 = vmatprep.subr.mxu1 %v183_v39  ;;  %254 = vmatprep.subr.mxu0 %v113_v42  ;;  %v120_v61 = vld [vmem:[#allocation5 + $0xb8] sm:$0xff]  ;;  %v97_v1 = vld [vmem:[#allocation5] sm:$0xff]  ;;  %v191_v3 = vld [vmem:[#allocation5 + $0x2f0] sm:$0xff] }
  0x3c   :  { %857 = vmatpush3.msra.mxu1 %v135_v41  ;;  %255 = vmatpush1.msra.mxu0 %v112_v44  ;;  %v117_v2 = vld [vmem:[#allocation5 + $0xa0] sm:$0xff]  ;;  %v1077_v4 = vld [vmem:[#allocation2 + $0x28] sm:$0xff]  ;;  %v188_v8 = vld [vmem:[#allocation5 + $0x2d8] sm:$0xff] }
  0x3d   :  { %858 = vmatprep.subr.mxu1 %v180_v43  ;;  %256 = vmatprep.subr.mxu0 %v110_v46  ;;  %v162_v5 = vld [vmem:[#allocation5 + $0x208] sm:$0xff]  ;;  %v159_v9 = vld [vmem:[#allocation5 + $0x1f0] sm:$0xff]  ;;  %v185_v12 = vld [vmem:[#allocation5 + $0x2c0] sm:$0xff] }
  0x3e   :  { %859 = vmatpush3.msra.mxu1 %v132_v45  ;;  %257 = vmatpush1.msra.mxu0 %v109_v48  ;;  %v190_v6 = vld [vmem:[#allocation5 + $0x2e8] sm:$0xff]  ;;  %v187_v10 = vld [vmem:[#allocation5 + $0x2d0] sm:$0xff]  ;;  %v1082_v13 = vld [vmem:[#allocation2 + $0x40] sm:$0xff] }
  0x3f   :  { %860 = vmatprep.subr.mxu1 %v177_v47  ;;  %258 = vmatprep.subr.mxu0 %v107_v50  ;;  %v114_v7 = vld [vmem:[#allocation5 + $0x88] sm:$0xff]  ;;  %v111_v11 = vld [vmem:[#allocation5 + $0x70] sm:$0xff]  ;;  %v156_v14 = vld [vmem:[#allocation5 + $0x1d8] sm:$0xff] }
  0x40   :  { %861 = vmatpush3.msra.mxu1 %v129_v49  ;;  %259 = vmatpush1.msra.mxu0 %v106_v52  ;;  %v184_v15 = vld [vmem:[#allocation5 + $0x2b8] sm:$0xff]  ;;  %v182_v17 = vld [vmem:[#allocation5 + $0x2a8] sm:$0xff]  ;;  %v153_v18 = vld [vmem:[#allocation5 + $0x1c0] sm:$0xff] }
  0x41   :  { %862 = vmatprep.subr.mxu1 %v174_v51  ;;  %260 = vmatprep.subr.mxu0 %v104_v54  ;;  %v108_v16 = vld [vmem:[#allocation5 + $0x58] sm:$0xff]  ;;  %v181_v19 = vld [vmem:[#allocation5 + $0x2a0] sm:$0xff]  ;;  %v179_v21 = vld [vmem:[#allocation5 + $0x290] sm:$0xff] }
  0x42   :  { %863 = vmatpush3.msra.mxu1 %v126_v53  ;;  %261 = vmatpush1.msra.mxu0 %v103_v56  ;;  %v105_v20 = vld [vmem:[#allocation5 + $0x40] sm:$0xff]  ;;  %v1087_v22 = vld [vmem:[#allocation2 + $0x58] sm:$0xff]  ;;  %v150_v23 = vld [vmem:[#allocation5 + $0x1a8] sm:$0xff] }
  0x43   :  { %864 = vmatprep.subr.mxu1 %v171_v55  ;;  %262 = vmatprep.subr.mxu0 %v101_v58  ;;  %v178_v24 = vld [vmem:[#allocation5 + $0x288] sm:$0xff]  ;;  %v176_v26 = vld [vmem:[#allocation5 + $0x278] sm:$0xff]  ;;  %v147_v27 = vld [vmem:[#allocation5 + $0x190] sm:$0xff] }
  0x44   :  { %865 = vmatpush3.msra.mxu1 %v123_v57  ;;  %263 = vmatpush1.msra.mxu0 %v100_v60  ;;  %v102_v25 = vld [vmem:[#allocation5 + $0x28] sm:$0xff]  ;;  %v175_v29 = vld [vmem:[#allocation5 + $0x270] sm:$0xff]  ;;  %v173_v32 = vld [vmem:[#allocation5 + $0x260] sm:$0xff] }
  0x45   :  { %866 = vmatprep.subr.mxu1 %v168_v59  ;;  %264 = vmatprep.subr.mxu0 %v98_v62  ;;  %v99_v30 = vld [vmem:[#allocation5 + $0x10] sm:$0xff]  ;;  %v1092_v31 = vld [vmem:[#allocation2 + $0x8] sm:$0xff]  ;;  %v1094_v33 = vld [vmem:[#allocation2] sm:$0xff] }
  0x46   :  { %867 = vmatpush3.msra.mxu1 %v120_v61  ;;  %265 = vmatpush1.msra.mxu0 %v97_v1  ;;  %v1096_v34 = vld [vmem:[#allocation2 + $0x20] sm:$0xff]  ;;  %v170_v35 = vld [vmem:[#allocation5 + $0x248] sm:$0xff]  ;;  %v167_v38 = vld [vmem:[#allocation5 + $0x230] sm:$0xff] }
  0x47   :  { %868 = vmatprep.subr.mxu1 %v165_v63  ;;  %393 = vmatprep.mubr.f32.mxu1 %v1027_v0  ;;  %v210_v36 = vld [vmem:[#allocation5 + $0x388] sm:$0xf]  ;;  %v169_v37 = vld [vmem:[#allocation5 + $0x240] sm:$0xff]  ;;  %v1101_v39 = vld [vmem:[#allocation2 + $0x18] sm:$0xff] }
  0x48   :  { %869 = vmatpush3.msra.mxu1 %v117_v2  ;;  %266 = vmatprep.subr.mxu0 %v191_v3  ;;  %v166_v40 = vld [vmem:[#allocation5 + $0x228] sm:$0xff]  ;;  %v207_v41 = vld [vmem:[#allocation5 + $0x370] sm:$0xff]  ;;  %v164_v42 = vld [vmem:[#allocation5 + $0x218] sm:$0xff] }
  0x49   :  { %842 = vmatmul.mubr.msk.f32.gmra.mxu1 %vm211_vm1, %v1077_v4  ;;  %870 = vmatprep.subr.mxu1 %v162_v5  ;;  %v92_v43 = vld [vmem:[#allocation2 + $0x38] sm:$0xff]  ;;  %v163_v44 = vld [vmem:[#allocation5 + $0x210] sm:$0xff]  ;;  %v161_v45 = vld [vmem:[#allocation5 + $0x200] sm:$0xff] }
  0x4a   :  { %267 = vmatpush2.msra.mxu0 %v190_v6  ;;  %871 = vmatpush3.msra.mxu1 %v114_v7  ;;  %v91_v46 = vld [vmem:[#allocation2 + $0x30] sm:$0xff]  ;;  %v204_v47 = vld [vmem:[#allocation5 + $0x358] sm:$0xff]  ;;  %v158_v49 = vld [vmem:[#allocation5 + $0x1e8] sm:$0xff] }
  0x4b   :  { %268 = vmatprep.subr.mxu0 %v188_v8  ;;  %872 = vmatprep.subr.mxu1 %v159_v9  ;;  %v160_v48 = vld [vmem:[#allocation5 + $0x1f8] sm:$0xff]  ;;  %v201_v50 = vld [vmem:[#allocation5 + $0x340] sm:$0xff]  ;;  %v95_v52 = vld [vmem:[#allocation2 + $0x50] sm:$0xff] }
  0x4c   :  { %269 = vmatpush2.msra.mxu0 %v187_v10  ;;  %399 = vmatprep.mubr.f32.mxu1 %v1027_v0  ;;  %v157_v51 = vld [vmem:[#allocation5 + $0x1e0] sm:$0xff]  ;;  %v155_v53 = vld [vmem:[#allocation5 + $0x1d0] sm:$0xff]  ;;  %v94_v54 = vld [vmem:[#allocation2 + $0x48] sm:$0xff] }
  0x4d   :  { %873 = vmatpush3.msra.mxu1 %v111_v11  ;;  %270 = vmatprep.subr.mxu0 %v185_v12  ;;  %v198_v55 = vld [vmem:[#allocation5 + $0x328] sm:$0xff]  ;;  %v152_v57 = vld [vmem:[#allocation5 + $0x1b8] sm:$0xff]  ;;  %v195_v58 = vld [vmem:[#allocation5 + $0x310] sm:$0xff] }
  0x4e   :  { %843 = vmatmul.mubr.msk.f32.gmra.mxu1 %vm211_vm1, %v1082_v13  ;;  %874 = vmatprep.subr.mxu1 %v156_v14  ;;  %v154_v56 = vld [vmem:[#allocation5 + $0x1c8] sm:$0xff]  ;;  %v151_v59 = vld [vmem:[#allocation5 + $0x1b0] sm:$0xff]  ;;  %v149_v60 = vld [vmem:[#allocation5 + $0x1a0] sm:$0xff] }
  0x4f   :  { %271 = vmatpush2.msra.mxu0 %v184_v15  ;;  %875 = vmatpush3.msra.mxu1 %v108_v16  ;;  %v148_v61 = vld [vmem:[#allocation5 + $0x198] sm:$0xff]  ;;  %v146_v62 = vld [vmem:[#allocation5 + $0x188] sm:$0xff]  ;;  %v145_v63 = vld [vmem:[#allocation5 + $0x180] sm:$0xff] }
  0x50   :  { %272 = vmatprep.subr.mxu0 %v182_v17  ;;  %876 = vmatprep.subr.mxu1 %v153_v18 }
  0x51   :  { %273 = vmatpush2.msra.mxu0 %v181_v19  ;;  %405 = vmatprep.mubr.f32.mxu1 %v1027_v0  ;;  %v172_v0 = vld [vmem:[#allocation5 + $0x258] sm:$0xff] }
  0x52   :  { %877 = vmatpush3.msra.mxu1 %v105_v20  ;;  %274 = vmatprep.subr.mxu0 %v179_v21 }
  0x53   :  { %844 = vmatmul.mubr.msk.f32.gmra.mxu1 %vm211_vm1, %v1087_v22  ;;  %878 = vmatprep.subr.mxu1 %v150_v23 }
  0x54   :  { %275 = vmatpush2.msra.mxu0 %v178_v24  ;;  %879 = vmatpush3.msra.mxu1 %v102_v25 }
  0x55   :  { %276 = vmatprep.subr.mxu0 %v176_v26  ;;  %880 = vmatprep.subr.mxu1 %v147_v27 }
  0x56   :  { %277 = vmatpush2.msra.mxu0 %v175_v29  ;;  %881 = vmatpush3.msra.mxu1 %v99_v30 }
  0x57   :  { %476 = vmatprep.mubr.f32.mxu1 %v1092_v31  ;;  %278 = vmatprep.subr.mxu0 %v173_v32 }
  0x58   :  { %477 = vmatmul.mubr.f32.vlgmr.msra.gmra.mxu1 %v1094_v33  ;;  %279 = vmatpush2.msra.mxu0 %v172_v0 }
  0x59   :  { %481 = vmatprep.mubr.f32.mxu1 %v1096_v34  ;;  %280 = vmatprep.subr.mxu0 %v170_v35 }
  0x5a   :  { %904 = vmatprep.subr.msk.mxu1 %vm224_vm0, %v210_v36  ;;  %281 = vmatpush2.msra.mxu0 %v169_v37 }
  0x5b   :  { %905 = vmatpush3.msk.msra.mxu1 %vm224_vm0, %v210_v36  ;;  %282 = vmatprep.subr.mxu0 %v167_v38 }
  0x5c   :  { %482 = vmatmul.mubr.f32.gmra.mxu1 %v1101_v39  ;;  %283 = vmatpush2.msra.mxu0 %v166_v40 }
  0x5d   :  { %906 = vmatprep.subr.mxu1 %v207_v41  ;;  %284 = vmatprep.subr.mxu0 %v164_v42 }
  0x5e   :  { %486 = vmatprep.mubr.f32.mxu1 %v92_v43  ;;  %285 = vmatpush2.msra.mxu0 %v163_v44 }
  0x5f   :  { %907 = vmatpush3.msra.mxu1 %v207_v41  ;;  %286 = vmatprep.subr.mxu0 %v161_v45 }
  0x60   :  { %487 = vmatmul.mubr.f32.gmra.mxu1 %v91_v46  ;;  %908 = vmatprep.subr.mxu1 %v204_v47 }
  0x61   :  { %287 = vmatpush2.msra.mxu0 %v160_v48  ;;  %909 = vmatpush3.msra.mxu1 %v204_v47 }
  0x62   :  { %288 = vmatprep.subr.mxu0 %v158_v49  ;;  %910 = vmatprep.subr.mxu1 %v201_v50 }
  0x63   :  { %289 = vmatpush2.msra.mxu0 %v157_v51  ;;  %491 = vmatprep.mubr.f32.mxu1 %v95_v52 }
  0x64   :  { %911 = vmatpush3.msra.mxu1 %v201_v50  ;;  %290 = vmatprep.subr.mxu0 %v155_v53 }
  0x65   :  { %492 = vmatmul.mubr.f32.gmra.mxu1 %v94_v54  ;;  %912 = vmatprep.subr.mxu1 %v198_v55 }
  0x66   :  { %291 = vmatpush2.msra.mxu0 %v154_v56  ;;  %913 = vmatpush3.msra.mxu1 %v198_v55 }
  0x67   :  { %292 = vmatprep.subr.mxu0 %v152_v57  ;;  %914 = vmatprep.subr.mxu1 %v195_v58 }
  0x68   :  { %293 = vmatpush2.msra.mxu0 %v151_v59  ;;  %915 = vmatpush3.msra.mxu1 %v195_v58 }
  0x69   :  { %916 = vmatprep.mubr.msk.f32.mxu1 %vm211_vm1, %v1073_v28  ;;  %294 = vmatprep.subr.mxu0 %v149_v60 }
  0x6a   :  { %917 = vmatmul.mubr.msk.f32.vlgmr.msra.gmra.mxu1 %vm211_vm1, %v1077_v4  ;;  %295 = vmatpush2.msra.mxu0 %v148_v61 }
  0x6b   :  { %298 = vmatprep.mubr.f32.mxu0 %v1092_v31  ;;  %296 = vmatprep.subr.mxu0 %v146_v62 }
  0x6c   :  { %919 = vmatprep.mubr.msk.f32.mxu1 %vm211_vm1, %v1082_v13  ;;  %297 = vmatpush2.msra.mxu0 %v145_v63 }
  0x6d   :  { %299 = vmatmul.mubr.f32.vlgmr.msra.gmra.mxu0 %v1094_v33 }
  0x6e   :  { %920 = vmatmul.mubr.msk.f32.gmra.mxu1 %vm211_vm1, %v1087_v22  ;;  %304 = vmatprep.mubr.f32.mxu0 %v1096_v34 }
  0x71   :  { %305 = vmatmul.mubr.f32.gmra.mxu0 %v1101_v39 }
  0x72   :  { %310 = vmatprep.mubr.f32.mxu0 %v92_v43 }
  0x75   :  { %311 = vmatmul.mubr.f32.gmra.mxu0 %v91_v46 }
  0x76   :  { %316 = vmatprep.mubr.f32.mxu0 %v95_v52 }
  0x79   :  { %317 = vmatmul.mubr.f32.gmra.mxu0 %v94_v54 }
  0xf5   :  { %v389_v28 = vpop.f32.mrf.mxu1 }
  0xf7   :  { %v391_v1 = vpop.f32.mrf.mxu1 }
 0x109   :  { %v395_v2 = vpop.f32.mrf.mxu1 }
 0x10b   :  { %v397_v3 = vpop.f32.mrf.mxu1 }
 0x10e   :  { %v401_v4 = vpop.f32.mrf.mxu1 }
 0x110   :  { %v403_v5 = vpop.f32.mrf.mxu1 }
 0x113   :  { %v407_v6 = vpop.f32.mrf.mxu1 }
 0x115   :  { %v409_v7 = vpop.f32.mrf.mxu1 }
 0x118   :  { %v882_v8 = vpop.f32.mrf.mxu1 }
 0x11a   :  { %v883_v9 = vpop.f32.mrf.mxu1 }
 0x11b   :  { %v884_v18 = vadd.f32 %v883_v9, %v882_v8 }
 0x11c   :  { %v885_v10 = vpop.f32.mrf.mxu1 }
 0x11e   :  { %v886_v11 = vpop.f32.mrf.mxu1 }
 0x11f   :  { %v887_v16 = vadd.f32 %v886_v11, %v885_v10 }
 0x120   :  { %v888_v12 = vpop.f32.mrf.mxu1 }
 0x122   :  { %v889_v13 = vpop.f32.mrf.mxu1 }
 0x123   :  { %v890_v23 = vadd.f32 %v889_v13, %v888_v12 }
 0x125   :  { %v891_v14 = vpop.f32.mrf.mxu1 }
 0x127   :  { %v892_v15 = vpop.f32.mrf.mxu1 }
 0x128   :  { %v893_v19 = vadd.f32 %v892_v15, %v891_v14 }
 0x12a   :  { %v918_v17 = vpop.f32.mrf.mxu1 }
 0x12b   :  { %v569_v20 = vadd.f32 %v918_v17, %v887_v16 }
 0x12c   :  { %v563_v21 = vpop.f32.mrf.mxu1 }
 0x12d   :  { %v564_v22 = vadd.f32 %v884_v18, %v563_v21  ;;  %v300_v24 = vpop.f32.mrf.mxu0 }
 0x12e   :  { %v921_v25 = vpop.f32.mrf.mxu1  ;;  %v390_v34 = vadd.f32 %v389_v28, %v300_v24 }
 0x12f   :  { %v579_v26 = vadd.f32 %v921_v25, %v893_v19  ;;  %v302_v27 = vpop.f32.mrf.mxu0  ;;  %v639_v33 = vadd.f32 %v569_v20, %v564_v22 }
 0x130   :  { %v573_v29 = vpop.f32.mrf.mxu1  ;;  %v392_v38 = vadd.f32 %v391_v1, %v302_v27 }
 0x131   :  { %v574_v30 = vadd.f32 %v890_v23, %v573_v29  ;;  %v306_v31 = vpop.f32.mrf.mxu0 }
 0x132   :  { %v396_v32 = vadd.f32 %v395_v2, %v306_v31 }
 0x133   :  { %v308_v0 = vpop.f32.mrf.mxu0  ;;  %v640_v36 = vadd.f32 %v639_v33, %v574_v30 }
 0x134   :  { %v398_v35 = vadd.f32 %v397_v3, %v308_v0  ;;  %v621_v45 = vadd.f32 %v396_v32, %v390_v34 }
 0x135   :  { %v312_v37 = vpop.f32.mrf.mxu0  ;;  %v641_v40 = vadd.f32 %v640_v36, %v579_v26 }
 0x136   :  { %v402_v39 = vadd.f32 %v401_v4, %v312_v37  ;;  %v630_v51 = vadd.f32 %v398_v35, %v392_v38 }
 0x137   :  { %v314_v41 = vpop.f32.mrf.mxu0  ;;  %v642_v43 = vrot.slane %v641_v40, 4 }
 0x138   :  { %v404_v42 = vadd.f32 %v403_v5, %v314_v41  ;;  %v622_v49 = vadd.f32 %v621_v45, %v402_v39 }
 0x139   :  { %v318_v44 = vpop.f32.mrf.mxu0  ;;  %v643_v47 = vadd.f32 %v642_v43, %v641_v40 }
 0x13a   :  { %v408_v46 = vadd.f32 %v407_v6, %v318_v44  ;;  %v631_v54 = vadd.f32 %v630_v51, %v404_v42 }
 0x13b   :  { %v320_v48 = vpop.f32.mrf.mxu0  ;;  %v644_v52 = vrot.slane %v643_v47, 2 }
 0x13c   :  { %v410_v50 = vadd.f32 %v409_v7, %v320_v48  ;;  %v623_v53 = vadd.f32 %v622_v49, %v408_v46 }
 0x13d   :  { %v645_v55 = vadd.f32 %v644_v52, %v643_v47 }
 0x13e   :  { %v624_v56 = vrot.slane %v623_v53, 4  ;;  %v632_v57 = vadd.f32 %v631_v54, %v410_v50 }
 0x13f   :  { %v646_v58 = vrot.slane %v645_v55, 1 }
 0x140   :  { %v625_v59 = vadd.f32 %v624_v56, %v623_v53  ;;  %v633_v60 = vrot.slane %v632_v57, 4 }
 0x141   :  { %v647_v61 = vadd.f32 %v646_v58, %v645_v55 }
 0x142   :  { %v626_v62 = vrot.slane %v625_v59, 2  ;;  %v634_v63 = vadd.f32 %v633_v60, %v632_v57 }
 0x143   :  { %v650_v28 = vmul.f32 0.03125, %v647_v61 }
 0x144   :  { %v627_v1 = vadd.f32 %v626_v62, %v625_v59  ;;  %v635_v2 = vrot.slane %v634_v63, 2 }
 0x145   :  { %v1118_v3 = vsub.f32 %v574_v30, %v650_v28  ;;  %v1120_v4 = vsub.f32 %v564_v22, %v650_v28  ;;  %v1122_v5 = vsub.f32 %v569_v20, %v650_v28  ;;  %v1124_v8 = vsub.f32 %v579_v26, %v650_v28 }
 0x146   :  { %v628_v6 = vrot.slane %v627_v1, 1  ;;  %v636_v7 = vadd.f32 %v635_v2, %v634_v63 }
 0x147   :  { %v665_v9 = vmul.f32 %v1120_v4, %v1120_v4  ;;  %v668_v10 = vmul.f32 %v1122_v5, %v1122_v5  ;;  %v671_v13 = vmul.f32 %v1118_v3, %v1118_v3  ;;  %v674_v17 = vmul.f32 %v1124_v8, %v1124_v8 }
 0x148   :  { %v629_v11 = vadd.f32 %v628_v6, %v627_v1  ;;  %v637_v12 = vrot.slane %v636_v7, 1  ;;  %v1028_v6 = vmov 1966171168  }
 0x149   :  { %v693_v14 = vadd.f32 %v668_v10, %v665_v9  ;;  %v719_v9 = vlaneseq }
 0x14a   :  { %v648_v15 = vmul.f32 0.03125, %v629_v11  ;;  %v638_v16 = vadd.f32 %v637_v12, %v636_v7  ;;  %v717_v7 = vunpack.c.l.s4 %v1028_v6 }
 0x14b   :  { %v694_v18 = vadd.f32 %v693_v14, %v671_v13  ;;  %v720_v11 = vshrl.u32 %v719_v9, 7 }
 0x14c   :  { %v649_v19 = vmul.f32 0.03125, %v638_v16  ;;  %v1134_v20 = vsub.f32 %v390_v34, %v648_v15  ;;  %v1136_v21 = vsub.f32 %v396_v32, %v648_v15  ;;  %v1138_v22 = vsub.f32 %v402_v39, %v648_v15 }
 0x14d   :  { %v695_v23 = vadd.f32 %v694_v18, %v674_v17  ;;  %v1146_v27 = vsub.f32 %v408_v46, %v648_v15  ;;  %v718_v10 = vunpack.c.0.s8 %v717_v7 }
 0x14e   :  { %v1140_v24 = vsub.f32 %v392_v38, %v649_v19  ;;  %v1142_v25 = vsub.f32 %v398_v35, %v649_v19  ;;  %v1144_v26 = vsub.f32 %v404_v42, %v649_v19  ;;  %v663_v29 = vmul.f32 %v1134_v20, %v1134_v20 }
 0x14f   :  { %v666_v30 = vmul.f32 %v1136_v21, %v1136_v21  ;;  %v1152_v31 = vsub.f32 %v410_v50, %v649_v19  ;;  %v696_v0 = vrot.slane %v695_v23, 4  ;;  %v669_v34 = vmul.f32 %v1138_v22, %v1138_v22 }
 0x150   :  { %v664_v32 = vmul.f32 %v1140_v24, %v1140_v24  ;;  %v667_v33 = vmul.f32 %v1142_v25, %v1142_v25  ;;  %v670_v36 = vmul.f32 %v1144_v26, %v1144_v26  ;;  %v672_v39 = vmul.f32 %v1146_v27, %v1146_v27 }
 0x151   :  { %v675_v35 = vadd.f32 %v666_v30, %v663_v29  ;;  %v697_v38 = vadd.f32 %v696_v0, %v695_v23  ;;  %v673_v41 = vmul.f32 %v1152_v31, %v1152_v31  ;;  %v721_v14 = vsub.s32 %v718_v10, %v720_v11  ;;  %v711_v23 = vld [vmem:[%s1189_s2] sm:$0x7]  ;;  %s1029_s2 = smov [#allocation8]  }
 0x152   :  { %v684_v37 = vadd.f32 %v667_v33, %v664_v32  ;;  %v743_v30 = vsub.s32 0, %v720_v11  ;;  %v747_v32 = vsub.s32 1, %v720_v11  ;;  %v751_v33 = vsub.s32 2, %v720_v11  ;;  %s826_s6 = sshll.u32 %s1029_s2, 4  ;;  %s827_s6 = int_to_ptr.vmem [resolvable:$true] %s826_s6 }
 0x153   :  { %v676_v40 = vadd.f32 %v675_v35, %v669_v34  ;;  %v698_v43 = vrot.slane %v697_v38, 2  ;;  %v768_v34 = vld [vmem:[#allocation7] sm:$0x7]  ;;  %s996_s7 = scalar_lea.vmem %s827_s6, 1536  ;;  %p1001_p2 = scmp.lt.s32.totalorder %s827_s6, %s827_s6 }
 0x154   :  { %v685_v42 = vadd.f32 %v684_v37, %v670_v36  ;;  %p997_p1 = scmp.ne.s32.totalorder %s827_s6, %s996_s7  ;;  %p1002_p3 = scmp.lt.s32.totalorder %s996_s7, %s996_s7 }
 0x155   :  { %v677_v44 = vadd.f32 %v676_v40, %v672_v39  ;;  %v699_v46 = vadd.f32 %v698_v43, %v697_v38  ;;  %v773_v38 = vrot.slane %v768_v34, %v743_v30  ;;  %v777_v39 = vrot.slane %v768_v34, %v747_v32 }
 0x156   :  { %v686_v45 = vadd.f32 %v685_v42, %v673_v41  ;;  %v781_v40 = vrot.slane %v768_v34, %v751_v33  ;;  %p1003_p4 = por %p1002_p3, %p1001_p2 }
 0x157   :  { %v678_v47 = vrot.slane %v677_v44, 4  ;;  %v700_v49 = vrot.slane %v699_v46, 1 }
 0x158   :  { %v687_v48 = vrot.slane %v686_v45, 4  ;;  %p1004_p5 = pnand %p1003_p4, %p997_p1 }
 0x159   :  { %v679_v50 = vadd.f32 %v678_v47, %v677_v44  ;;  %v701_v52 = vadd.f32 %v700_v49, %v699_v46 }
 0x15a   :  { %v688_v51 = vadd.f32 %v687_v48, %v686_v45 }
 0x15b   :  { %v680_v53 = vrot.slane %v679_v50, 2  ;;  %v704_v57 = vmul.f32 0.03125, %v701_v52 }
 0x15c   :  { %v689_v54 = vrot.slane %v688_v51, 2 }
 0x15d   :  { %v681_v55 = vadd.f32 %v680_v53, %v679_v50  ;;  %v707_v62 = vadd.f32 1e-05, %v704_v57 }
 0x15e   :  { %v690_v56 = vadd.f32 %v689_v54, %v688_v51 }
 0x15f   :  { %v682_v58 = vrot.slane %v681_v55, 1  ;;  %930 = vrsqrt.f32 %v707_v62 }
 0x160   :  { %v691_v59 = vrot.slane %v690_v56, 1 }
 0x161   :  { %v683_v60 = vadd.f32 %v682_v58, %v681_v55 }
 0x162   :  { %v692_v61 = vadd.f32 %v691_v59, %v690_v56 }
 0x163   :  { %v702_v63 = vmul.f32 0.03125, %v683_v60 }
 0x164   :  { %v703_v28 = vmul.f32 0.03125, %v692_v61 }
 0x165   :  { %v705_v1 = vadd.f32 1e-05, %v702_v63 }
 0x166   :  { %v706_v2 = vadd.f32 1e-05, %v703_v28 }
 0x167   :  { %932 = vrsqrt.f32 %v705_v1 }
 0x168   :  { %934 = vrsqrt.f32 %v706_v2 }
 0x16c   :  { %v931_v12 = vpop.eup %930 }
 0x16d   :  { %v729_v18 = vrot.slane %v931_v12, %v721_v14 }
 0x174   :  { %v933_v13 = vpop.eup %932 }
 0x175   :  { %v935_v15 = vpop.eup %934 }
 0x176   :  { %v715_v16 = vcombine.low %v933_v13, %v935_v15 }
 0x178   :  { %v722_v17 = vrot.slane %v715_v16, %v721_v14 }
 0x17a   :  { %v730_v19 = vcombine.low %v722_v17, %v729_v18 }
 0x17c   :  { %v737_v29 = vrot.slane %v730_v19, %v721_v14 }
 0x17e   :  { %v739_v0 = vmul.f32 %v737_v29, %v711_v23 }
 0x180   :  { %v744_v35 = vrot.slane %v739_v0, %v743_v30  ;;  %v748_v36 = vrot.slane %v739_v0, %v747_v32  ;;  %v752_v37 = vrot.slane %v739_v0, %v751_v33 }
 0x182   :  { %v756_v41 = vmul.f32 %v744_v35, %v1134_v20  ;;  %v757_v42 = vmul.f32 %v748_v36, %v1140_v24  ;;  %v758_v43 = vmul.f32 %v752_v37, %v1120_v4  ;;  %v759_v44 = vmul.f32 %v744_v35, %v1136_v21 }
 0x183   :  { %v760_v45 = vmul.f32 %v748_v36, %v1142_v25  ;;  %v761_v46 = vmul.f32 %v752_v37, %v1122_v5  ;;  %v762_v47 = vmul.f32 %v744_v35, %v1138_v22  ;;  %v763_v48 = vmul.f32 %v748_v36, %v1144_v26 }
 0x184   :  { %v764_v49 = vmul.f32 %v752_v37, %v1118_v3  ;;  %v765_v50 = vmul.f32 %v744_v35, %v1146_v27  ;;  %v766_v20 = vmul.f32 %v748_v36, %v1152_v31  ;;  %v767_v24 = vmul.f32 %v752_v37, %v1124_v8 }
 0x185   :  { %v785_v51 = vadd.f32 %v773_v38, %v756_v41  ;;  %v786_v4 = vadd.f32 %v777_v39, %v757_v42  ;;  %v787_v52 = vadd.f32 %v781_v40, %v758_v43  ;;  %v788_v21 = vadd.f32 %v773_v38, %v759_v44 }
 0x186   :  { %v789_v53 = vadd.f32 %v777_v39, %v760_v45  ;;  %v790_v25 = vadd.f32 %v781_v40, %v761_v46  ;;  %v791_v54 = vadd.f32 %v773_v38, %v762_v47  ;;  %v792_v5 = vadd.f32 %v777_v39, %v763_v48 }
 0x187   :  { %v793_v55 = vadd.f32 %v781_v40, %v764_v49  ;;  %v794_v22 = vadd.f32 %v773_v38, %v765_v50  ;;  %v795_v56 = vadd.f32 %v777_v39, %v766_v20  ;;  %v796_v26 = vadd.f32 %v781_v40, %v767_v24 }
 0x188   :  { %v797_v3 = vmax.f32 %v785_v51, 0.0  ;;  %v798_v27 = vmax.f32 %v786_v4, 0.0  ;;  %v799_v57 = vmax.f32 %v787_v52, 0.0  ;;  %v800_v31 = vmax.f32 %v788_v21, 0.0 }
 0x189   :  { %v801_v58 = vmax.f32 %v789_v53, 0.0  ;;  %v802_v8 = vmax.f32 %v790_v25, 0.0  ;;  %v803_v59 = vmax.f32 %v791_v54, 0.0  ;;  %v804_v60 = vmax.f32 %v792_v5, 0.0 }
 0x18a   :  { %v805_v61 = vmax.f32 %v793_v55, 0.0  ;;  %v806_v62 = vmax.f32 %v794_v22, 0.0  ;;  %v807_v63 = vmax.f32 %v795_v56, 0.0  ;;  %v808_v28 = vmax.f32 %v796_v26, 0.0  ;;  %810 = vst [vmem:[#allocation8 + $0x8] sm:$0xff] %v798_v27  ;;  %809 = vst [vmem:[#allocation8] sm:$0xff] %v797_v3 }
 0x18b   :  { %811 = vst [vmem:[#allocation8 + $0x10] sm:$0xff] %v799_v57  ;;  %812 = vst [vmem:[#allocation8 + $0x18] sm:$0xff] %v800_v31 }
 0x18c   :  { %813 = vst [vmem:[#allocation8 + $0x20] sm:$0xff] %v801_v58  ;;  %816 = vst [vmem:[#allocation8 + $0x38] sm:$0xff] %v804_v60 }
 0x18d   :  { %814 = vst [vmem:[#allocation8 + $0x28] sm:$0xff] %v802_v8  ;;  %815 = vst [vmem:[#allocation8 + $0x30] sm:$0xff] %v803_v59 }
 0x18e   :  { %819 = vst [vmem:[#allocation8 + $0x50] sm:$0xff] %v807_v63  ;;  %817 = vst [vmem:[#allocation8 + $0x40] sm:$0xff] %v805_v61 }
 0x18f   :  { %818 = vst [vmem:[#allocation8 + $0x48] sm:$0xff] %v806_v62  ;;  %820 = vst [vmem:[#allocation8 + $0x58] sm:$0xff] %v808_v28 }
 0x190   :  { %1007 = shalt.err (!%p1004_p5)
}
 0x191   :  { %832 = dma.vmem_to_hbm [thread:$0]  %s827_s6, 1536, %s1191_s4, [#allocation4], %s1024_s20, %s1024_s20, %s1025_s21  }
 0x192   :  { %1020 = dma.done.wait [#allocation4], 1536  }
 0x193   :  { %1021 = vsyncadd [#allocation4], 4294965760 }
 0x194   :  { %836 = vsyncpa [#allocation3], 1 }
 0x195   :  { %837 = vsyncpa [#allocation6], 1 }
 0x196   :  { %838 = vsyncpa [#allocation4], 1 }

</bundles_post_ra>
